<compile_context>
chip_gen: v5e
topology: v5e:2x2
jax: 0.10.0
libtpu: 0.0.40
codegen_flags: <defaults>
</compile_context>

<pallas_src>
import jax
import jax.numpy as jnp
from jax import lax
from jax.experimental import pallas as pl
from jax.experimental.pallas import tpu as pltpu

MARGIN = 0.3
EPS_NORM_SQ = 1e-24     # (1e-12)^2 : F.normalize eps applied to ||x||^2
EPS_DIST = 1e-12        # clamp(min=) before sqrt
NEG_INF = float("-inf")

_TM_CANDS = (1024, 512, 256, 128, 64, 32, 16, 8)   # prefer large row tiles
_TN_CANDS = (256, 128, 64, 32, 16, 8)              # moderate column tiles


# ----------------------------------------------------------------------------
# Kernels
# ----------------------------------------------------------------------------
def _normalize_kernel(x_ref, o_ref):
    """Row-normalize one (tp, D) block: x / max(||x||, 1e-12)."""
    x = x_ref[...].astype(jnp.float32)
    ssq = jnp.sum(x * x, axis=1, keepdims=True)
    xn = x * lax.rsqrt(jnp.maximum(ssq, EPS_NORM_SQ))
    o_ref[...] = xn.astype(o_ref.dtype)


def _make_maxdist_kernel(n_valid):
    """Grid = (row tiles, col tiles); col axis is the running-max reduction."""

    def kernel(xr_ref, xc_ref, o_ref, m_ref):
        i = pl.program_id(0)
        j = pl.program_id(1)
        tm = xr_ref.shape[0]
        tn = xc_ref.shape[0]

        @pl.when(j == 0)
        def _():
            m_ref[...] = jnp.full_like(m_ref, NEG_INF)

        # Rows are unit-norm (pre-pass), so dist2 = 2 - 2 * <xi, xj>.
        gram = lax.dot_general(
            xr_ref[...], xc_ref[...], (((1,), (1,)), ((), ())),
            preferred_element_type=jnp.float32)                  # (tm, tn)
        dist2 = 2.0 - 2.0 * gram

        row_lo = i * tm
        col_lo = j * tn
        hits_diag = jnp.logical_and(row_lo < col_lo + tn, col_lo < row_lo + tm)
        hits_pad = (col_lo + tn) > n_valid
        needs_mask = jnp.logical_or(hits_diag, hits_pad)

        @pl.when(needs_mask)
        def _():
            row_g = row_lo + lax.broadcasted_iota(jnp.int32, (tm, tn), 0)
            col_g = col_lo + lax.broadcasted_iota(jnp.int32, (tm, tn), 1)
            keep = jnp.logical_and(row_g != col_g, col_g < n_valid)
            masked = jnp.where(keep, dist2, NEG_INF)
            m_ref[...] = jnp.maximum(
                m_ref[...], jnp.max(masked, axis=1, keepdims=True))

        @pl.when(jnp.logical_not(needs_mask))
        def _():
            m_ref[...] = jnp.maximum(
                m_ref[...], jnp.max(dist2, axis=1, keepdims=True))

        @pl.when(j == pl.num_programs(1) - 1)
        def _():
            # sqrt is monotone: max(sqrt(clamp(d2))) == sqrt(clamp(max(d2))),
            # so clamp + sqrt + margin run once per row, not once per pair.
            d = jnp.sqrt(jnp.maximum(m_ref[...], EPS_DIST))      # (tm, 1)
            hinge = jnp.maximum(d + MARGIN, 0.0)
            o_ref[...] = jnp.transpose(hinge).reshape(1, 1, tm)  # lane-dense

    return kernel


# ----------------------------------------------------------------------------
# Tile / VMEM planning
# ----------------------------------------------------------------------------
def _round_up(x, m):
    return (x + m - 1) // m * m


def _vmem_plan():
    """(vmem_limit_bytes, block_budget_bytes), safe per TPU generation."""
    cap = 0
    try:
        cap = int(getattr(pltpu.get_tpu_info(), "vmem_capacity_bytes", 0))
    except Exception:
        cap = 0
    if cap >= 100 * 1024 * 1024:        # v5e / v6e class: 128 MiB VMEM
        limit = 96 * 1024 * 1024
    else:                                # v7x (64 MiB / TC) or unknown: be safe
        limit = 48 * 1024 * 1024
    return limit, (limit * 3) // 5       # headroom for pipelining / misc


def _main_footprint(tm, tn, d, in_bytes):
    # double-buffered row + column input blocks, f32 temporaries
    # (gram / dist2 / masked / iota pair), resident output block + scratch.
    return 2 * (tm + tn) * d * in_bytes + 5 * tm * tn * 4 + 32 * tm


def _plan_tiles(n, d, budget, in_bytes, max_tm, max_tn):
    max_tm = 1 << 30 if max_tm is None else max_tm
    max_tn = 1 << 30 if max_tn is None else max_tn

    # Small-problem fast path: one (n, n) tile, grid (1, 1).
    n8 = _round_up(n, 8)
    if (n8 <= 1024 and n8 <= max_tm and n8 <= max_tn
            and _main_footprint(n8, n8, d, in_bytes) <= budget):
        return n8, n8, n8

    # Tiled path.
    align = 128 if n >= 512 else 8
    n_pad = _round_up(n, align)
    tn_opts = [t for t in _TN_CANDS if t <= max_tn and n_pad % t == 0] or [8]
    tm_opts = [t for t in _TM_CANDS if t <= max_tm and n_pad % t == 0] or [8]

    tn = next((t for t in tn_opts
               if _main_footprint(tm_opts[-1], t, d, in_bytes) <= budget),
              tn_opts[-1])
    # Prefer the largest row tile the budget allows (column blocks are re-read
    # n_pad/tm times, so tm is the HBM-traffic lever), but keep grid[0] >= 2
    # so both v7x TensorCores get work.
    tm = next((t for t in tm_opts
               if n_pad // t >= 2
               and _main_footprint(t, tn, d, in_bytes) <= budget), None)
    if tm is None:
        tm = next((t for t in tm_opts
                   if _main_footprint(t, tn, d, in_bytes) <= budget),
                  tm_opts[-1])
    return n_pad, tm, tn


def _prepass_tile(n_pad, d, budget, out_bytes):
    cands = [t for t in (1024, 512, 256, 128, 64, 32, 16, 8) if n_pad % t == 0]
    if n_pad <= 1024:
        cands = [n_pad] + cands
    for t in cands:
        if 2 * t * d * (4 + out_bytes) <= budget:
            return t
    return 8


# ----------------------------------------------------------------------------
# Wrapper
# ----------------------------------------------------------------------------
def shared_shared_loss(embedded_a, *, use_bf16_gram=False,
                       max_tm=None, max_tn=None):
    """embedded_a: (N, D) float array -> scalar float32 loss.

    use_bf16_gram: opt-in MXU fast path (bf16 operands, f32 accumulate) for
    v5e/v6e; introduces ~1e-3 absolute error on the pairwise distances.
    """
    x = jnp.asarray(embedded_a, jnp.float32)
    n, d = x.shape
    # Note: N == 1 (fully masked row) yields ~MARGIN here; the PyTorch module
    # cannot produce a value for N == 1, so guard upstream if that can occur.

    vmem_limit, budget = _vmem_plan()
    in_bytes = 2 if use_bf16_gram else 4
    n_pad, tm, tn = _plan_tiles(n, d, budget, in_bytes, max_tm, max_tn)
    if n_pad != n:
        x = jnp.pad(x, ((0, n_pad - n), (0, 0)))

    norm_dtype = jnp.bfloat16 if use_bf16_gram else jnp.float32

    # Pre-pass: row-normalize once (removes per-step normalization work and
    # the per-step (tn,1)->(1,tn) transpose from the main kernel's inner loop).
    tp = _prepass_tile(n_pad, d, budget, in_bytes)
    xn = pl.pallas_call(
        _normalize_kernel,
        out_shape=jax.ShapeDtypeStruct((n_pad, d), norm_dtype),
        grid_spec=pltpu.PrefetchScalarGridSpec(
            num_scalar_prefetch=0,
            grid=(n_pad // tp,),
            in_specs=[pl.BlockSpec((tp, d), lambda i: (i, 0))],
            out_specs=pl.BlockSpec((tp, d), lambda i: (i, 0)),
        ),
        compiler_params=pltpu.CompilerParams(
            dimension_semantics=("parallel",),
            vmem_limit_bytes=vmem_limit),
    )(x)

    grid = (n_pad // tm, n_pad // tn)
    per_sample = pl.pallas_call(
        _make_maxdist_kernel(n),
        out_shape=jax.ShapeDtypeStruct((grid[0], 1, tm), jnp.float32),
        grid_spec=pltpu.PrefetchScalarGridSpec(
            num_scalar_prefetch=0,
            grid=grid,
            in_specs=[
                pl.BlockSpec((tm, d), lambda i, j: (i, 0)),   # row block
                pl.BlockSpec((tn, d), lambda i, j: (j, 0)),   # column block
            ],
            out_specs=pl.BlockSpec((1, 1, tm), lambda i, j: (i, 0, 0)),
            scratch_shapes=[pltpu.VMEM((tm, 1), jnp.float32)],  # running max
        ),
        compiler_params=pltpu.CompilerParams(
            dimension_semantics=("parallel", "arbitrary"),
            vmem_limit_bytes=vmem_limit),
    )(xn, xn)

    # MarginRankingLoss mean reduction over the N real rows: trivial XLA reduce.
    return jnp.mean(per_sample.reshape(n_pad)[:n])


# ----------------------------------------------------------------------------
# Pure-JAX reference (mirrors the PyTorch module's order of operations)
# ----------------------------------------------------------------------------
def _reference_loss(embedded_a):
    x = embedded_a.astype(jnp.float32)
    norm = jnp.sqrt(jnp.sum(x * x, axis=1, keepdims=True))
    xn = x / jnp.maximum(norm, 1e-12)
    sq = jnp.sum(xn * xn, axis=1, keepdims=True)
    gram = jnp.dot(xn, xn.T, precision=lax.Precision.HIGHEST)
    dist = jnp.sqrt(jnp.clip(sq + sq.T - 2.0 * gram, EPS_DIST, None))
    nb = x.shape[0]
    masked = jnp.where(~jnp.eye(nb, dtype=bool), dist, -jnp.inf)
    max_dist = jnp.max(masked, axis=1)
    return jnp.mean(jnp.maximum(max_dist + MARGIN, 0.0))


if __name__ == "__main__":
    # SharedSharedLoss has no learnable parameters; only the (N, D) embedding.
    key = jax.random.PRNGKey(0)
    k1, k2, k3 = jax.random.split(key, 3)

    # Small shape consistent with the module (batch=8, hidden=32): fast path.
    x1 = jax.random.normal(k1, (8, 32), dtype=jnp.float32)
    l1 = shared_shared_loss(x1)
    jax.block_until_ready(l1)
    r1 = _reference_loss(x1)
    assert jnp.allclose(l1, r1, rtol=1e-5, atol=1e-5), (l1, r1)

    # Tiled path with running max + gated diagonal masking: grid = (2, 4).
    x2 = jax.random.normal(k2, (64, 32), dtype=jnp.float32)
    l2 = shared_shared_loss(x2, max_tm=32, max_tn=16)
    jax.block_until_ready(l2)
    r2 = _reference_loss(x2)
    assert jnp.allclose(l2, r2, rtol=1e-5, atol=1e-5), (l2, r2)

    # Row-padding path (N not a multiple of 8): padded cols masked, rows sliced.
    x3 = jax.random.normal(k3, (10, 32), dtype=jnp.float32)
    l3 = shared_shared_loss(x3)
    jax.block_until_ready(l3)
    r3 = _reference_loss(x3)
    assert jnp.allclose(l3, r3, rtol=1e-5, atol=1e-5), (l3, r3)

    # Opt-in bf16 Gram fast path (looser tolerance by design).
    l4 = shared_shared_loss(x2, use_bf16_gram=True)
    jax.block_until_ready(l4)
    assert jnp.allclose(l4, r2, rtol=0.0, atol=5e-2), (l4, r2)

    print("KERNEL_OK")
</pallas_src>

<mosaic_0001>
module attributes {stable_mosaic.version = 11 : i64} {
  func.func @_normalize_kernel(%arg0: i32, %arg1: memref<8x32xf32, #tpu.memory_space<vmem>>, %arg2: memref<8x32xf32, #tpu.memory_space<vmem>>) attributes {dimension_semantics = [#tpu.dimension_semantics<parallel>], iteration_bounds = array<i64: 1>, scalar_prefetch = 0 : i64, scratch_operands = 0 : i64, tpu.core_type = #tpu.core_type<tc>, window_params = [{transform_indices = @transform_0, window_bounds = array<i64: 8, 32>}, {transform_indices = @transform_1, window_bounds = array<i64: 8, 32>}]} {
    %c0 = arith.constant 0 : index
    %c0_0 = arith.constant 0 : index
    %0 = vector.load %arg1[%c0, %c0_0] : memref<8x32xf32, #tpu.memory_space<vmem>>, vector<8x32xf32>
    %1 = arith.mulf %0, %0 : vector<8x32xf32>
    %cst = arith.constant dense<0.000000e+00> : vector<8xf32>
    %2 = vector.multi_reduction <add>, %1, %cst [1] : vector<8x32xf32> to vector<8xf32>
    %3 = vector.shape_cast %2 : vector<8xf32> to vector<8x1xf32>
    %cst_1 = arith.constant 1.000000e-24 : f32
    %4 = vector.broadcast %cst_1 : f32 to vector<8x1xf32>
    %5 = arith.maximumf %3, %4 : vector<8x1xf32>
    %6 = math.rsqrt %5 : vector<8x1xf32>
    %7 = vector.broadcast %6 : vector<8x1xf32> to vector<8x32xf32>
    %8 = arith.mulf %0, %7 : vector<8x32xf32>
    %c0_2 = arith.constant 0 : index
    %c0_3 = arith.constant 0 : index
    %9 = vector.load %arg2[%c0_2, %c0_3] : memref<8x32xf32, #tpu.memory_space<vmem>>, vector<8x32xf32>
    tpu.vector_store %arg2[%c0_2, %c0_3], %8 {strides = array<i32>} : memref<8x32xf32, #tpu.memory_space<vmem>>, vector<8x32xf32>,
    return
  }
  func.func @transform_0(%arg0: i32) -> (i32, i32) {
    %c0_i32 = arith.constant 0 : i32
    %c0_i32_0 = arith.constant 0 : i32
    return %arg0, %c0_i32 : i32, i32
  }
  func.func @transform_1(%arg0: i32) -> (i32, i32) {
    %c0_i32 = arith.constant 0 : i32
    %c0_i32_0 = arith.constant 0 : i32
    return %arg0, %c0_i32 : i32, i32
  }
}

</mosaic_0001>

<bundles_post_ra>
// kernel: tpu_custom_call.1
= control target key start
LH: loop header
LB: loop body
LE: loop exit
PB: predicated region body
PF: predicated region fallthrough
CT: control target
= control target key end

     0   :  { %6 = vsyncpa [#allocation3], 0  ;;  %s135_s0 = inlined_call_operand.hbm [shape: f32[8,32], index: 0, kind: input, shape index: {}]   ;;  %s136_s1 = inlined_call_operand.hbm [shape: f32[8,32], index: 1, kind: output, shape index: {}]  }
   0x1   :  { %7 = vsyncpa [#allocation4], 0  ;;  %s13_s8 = sshll.u32 %s135_s0, 4  ;;  %s115_s9 = smov [#allocation2]   ;;  %s14_s8 = int_to_ptr.hbm [resolvable:$true] %s13_s8 }
   0x2   :  { %s15_s10 = sshll.u32 %s115_s9, 4  ;;  %s16_s10 = int_to_ptr.vmem [resolvable:$true] %s15_s10 }
   0x3   :  { %18 = dma.hbm_to_vmem [thread:$0]  %s14_s8, 128, %s16_s10, [#allocation3]  }
   0x4   :  { %111 = dma.done.wait [#allocation3], 128  }
   0x5   :  { %112 = vsyncadd [#allocation3], 4294967168  ;;  %v23_v0 = vld [vmem:[#allocation2] sm:$0xff]  ;;  %vm25_vm0 = vcmask 261120   ;;  %s116_s0 = smov [#allocation5]   ;;  %s49_s14 = sshll.u32 %s136_s1, 4  ;;  %s50_s14 = int_to_ptr.hbm [resolvable:$true] %s49_s14 }
   0x6   :  { %v24_v1 = vmul.f32 %v23_v0, %v23_v0  ;;  %s47_s11 = sshll.u32 %s116_s0, 4  ;;  %s48_s11 = int_to_ptr.vmem [resolvable:$true] %s47_s11 }
   0x8   :  { %v26_v2 = vsel %vm25_vm0, %v24_v1, 0.0 }
   0x9   :  { %27 = vadd.xlane.f32.xlu0 %v26_v2 }
  0x7c   :  { %v28_v3 = vpop.xlane.xlu0 %27 }
  0x7d   :  { %v29_v4 = vmax.f32 %v28_v3, 1e-24 }
  0x7f   :  { %61 = vrsqrt.f32 %v29_v4  ;;  %vm36_vm2 = vweird.f32 %v29_v4 }
  0x85   :  { %v62_v5 = vpop.eup %61 }
  0x86   :  { %v31_v6 = vmul.f32 %v62_v5, %v29_v4  ;;  %vm37_vm1 = vweird.f32 %v62_v5 }
  0x87   :  { %vm38_vm3 = vmor %vm36_vm2, %vm37_vm1 }
  0x88   :  { %v32_v7 = vmul.f32 %v62_v5, %v31_v6 }
  0x8a   :  { %v33_v8 = vmul.f32 0.5, %v32_v7 }
  0x8c   :  { %v34_v9 = vsub.f32 1.5, %v33_v8 }
  0x8e   :  { %v35_v10 = vmul.f32 %v62_v5, %v34_v9 }
  0x90   :  { %v39_v11 = vsel %vm38_vm3, %v62_v5, %v35_v10 }
  0x91   :  { %v40_v12 = vmul.f32 %v39_v11, %v23_v0 }
  0x93   :  { %41 = vst.msk [vmem:[#allocation5] sm:$0xff] %vm25_vm0, %v40_v12 }
  0x94   :  { %52 = dma.vmem_to_hbm [thread:$0]  %s48_s11, 128, %s50_s14, [#allocation4]  }
  0x95   :  { %113 = dma.done.wait [#allocation4], 128  }
  0x96   :  { %114 = vsyncadd [#allocation4], 4294967168 }
  0x97   :  { %57 = vsyncpa [#allocation3], 1 }
  0x98   :  { %58 = vsyncpa [#allocation4], 1 }

</bundles_post_ra>
